<compile_context>
chip_gen: v6e
topology: v6e:2x2x1
jax: 0.10.0
libtpu: 0.0.40
codegen_flags: <defaults>
</compile_context>

<pallas_src>
import math
import functools

import jax
import jax.numpy as jnp
import numpy as np
from jax.experimental import pallas as pl
from jax.experimental.pallas import tpu as pltpu


def _sabnpt_kernel(x_ref, wqkv_ref, bqkv_ref, wd_ref, bd_ref, wf_ref, bf_ref,
                   o_ref, *, num_classes):
    # x_ref block: (1, S, H); wqkv_ref: (NH, H, 3*Dh); bqkv_ref: (NH, 1, 3*Dh);
    # wd_ref: (NH, Dh, H); bd_ref: (1, H); wf_ref: (H, CP); bf_ref: (1, CP);
    # o_ref block: (1, S, CP).
    x = x_ref[0]                                   # (S, H)
    S, H = x.shape
    NH, _, three_dh = wqkv_ref.shape
    Dh = three_dh // 3
    CP = o_ref.shape[-1]

    # --- fused, per-head-batched Q/K/V projection: one batched matmul ---
    xb = jnp.broadcast_to(x[None], (NH, S, H))
    qkv = jnp.einsum("nsh,nhe->nse", xb, wqkv_ref[...],
                     preferred_element_type=jnp.float32) + bqkv_ref[...]
    q = qkv[:, :, 0 * Dh:1 * Dh]                   # (NH, S, Dh)
    k = qkv[:, :, 1 * Dh:2 * Dh]
    v = qkv[:, :, 2 * Dh:3 * Dh]

    # --- scaled dot-product attention (mask_identity=False in SABNPT: no mask) ---
    scale = 1.0 / math.sqrt(Dh)
    scores = jnp.einsum("nqd,nkd->nqk", q, k,
                        preferred_element_type=jnp.float32) * scale   # (NH, S, S)
    m = jnp.max(scores, axis=-1, keepdims=True)
    p = jnp.exp(scores - m)
    inv_denom = pl.reciprocal(jnp.sum(p, axis=-1, keepdims=True), approx=True)
    probs = p * inv_denom                                             # softmax(dim=-1)
    ctx = jnp.einsum("nqk,nkd->nqd", probs, v,
                     preferred_element_type=jnp.float32)              # (NH, S, Dh)

    # --- output dense; head concat folded into batched matmul + sum over heads ---
    partial = jnp.einsum("nsd,ndh->nsh", ctx, wd_ref[...],
                         preferred_element_type=jnp.float32)          # (NH, S, H)
    attn_out = jnp.sum(partial, axis=0) + bd_ref[...]                 # (S, H)

    # --- final linear to a lane-padded class axis ---
    logits = jnp.dot(attn_out, wf_ref[...],
                     preferred_element_type=jnp.float32) + bf_ref[...]  # (S, CP)
    col = jax.lax.broadcasted_iota(jnp.int32, (S, CP), 1)
    logits = jnp.where(col < num_classes, logits, jnp.float32(-1e30))

    # --- log_softmax over the class axis (== dim=1 after squeeze when B == 1) ---
    lmax = jnp.max(logits, axis=-1, keepdims=True)
    lse = jnp.log(jnp.sum(jnp.exp(logits - lmax), axis=-1, keepdims=True)) + lmax
    o_ref[0] = (logits - lse).astype(o_ref.dtype)


def prepare_params(params, *, num_heads, lane_pad=128):
    """One-time weight packing (outside the hot path): pre-transpose, group by head,
    fuse Q/K/V, and lane-pad the final linear."""
    H = params["wq"].shape[1]
    C = params["wf"].shape[0]
    Dh = H // num_heads

    def per_head_w(w):   # nn.Linear weight (out, in) -> (NH, in, Dh)
        return jnp.transpose(jnp.asarray(w).T.reshape(H, num_heads, Dh), (1, 0, 2))

    def per_head_b(b):   # bias (H,) -> (NH, 1, Dh)
        return jnp.asarray(b).reshape(num_heads, 1, Dh)

    w_qkv = jnp.concatenate([per_head_w(params["wq"]),
                             per_head_w(params["wk"]),
                             per_head_w(params["wv"])], axis=-1)   # (NH, H, 3*Dh)
    b_qkv = jnp.concatenate([per_head_b(params["bq"]),
                             per_head_b(params["bk"]),
                             per_head_b(params["bv"])], axis=-1)   # (NH, 1, 3*Dh)

    w_d = jnp.asarray(params["wd"]).T.reshape(num_heads, Dh, H)    # (NH, Dh, H)
    b_d = jnp.asarray(params["bd"]).reshape(1, H)

    CP = max(lane_pad, ((C + lane_pad - 1) // lane_pad) * lane_pad)
    w_f = jnp.zeros((H, CP), jnp.float32).at[:, :C].set(jnp.asarray(params["wf"]).T)
    b_f = jnp.zeros((1, CP), jnp.float32).at[:, :C].set(jnp.asarray(params["bf"]))

    prep = {"w_qkv": w_qkv, "b_qkv": b_qkv, "w_d": w_d, "b_d": b_d,
            "w_f": w_f, "b_f": b_f}
    return prep, C


@functools.partial(jax.jit, static_argnames=("num_classes",))
def sab_npt_forward(x, prep, *, num_classes):
    """x: (B, S, H) float32 with B == 1.  Returns log-probs of shape (S, C)."""
    B, S, H = x.shape
    assert B == 1, "PyTorch squeeze()+log_softmax(dim=1) semantics assume batch == 1"
    NH, _, three_dh = prep["w_qkv"].shape
    Dh = three_dh // 3
    CP = prep["w_f"].shape[1]

    out = pl.pallas_call(
        functools.partial(_sabnpt_kernel, num_classes=num_classes),
        out_shape=jax.ShapeDtypeStruct((B, S, CP), jnp.float32),
        grid=(B,),
        in_specs=[
            pl.BlockSpec((1, S, H), lambda b: (b, 0, 0)),          # x
            pl.BlockSpec((NH, H, three_dh), lambda b: (0, 0, 0)),  # fused W_qkv (per head)
            pl.BlockSpec((NH, 1, three_dh), lambda b: (0, 0, 0)),  # fused b_qkv
            pl.BlockSpec((NH, Dh, H), lambda b: (0, 0, 0)),        # Wd per head
            pl.BlockSpec((1, H), lambda b: (0, 0)),                # bd
            pl.BlockSpec((H, CP), lambda b: (0, 0)),               # Wf (lane-padded)
            pl.BlockSpec((1, CP), lambda b: (0, 0)),               # bf (lane-padded)
        ],
        out_specs=pl.BlockSpec((1, S, CP), lambda b: (b, 0, 0)),
        compiler_params=pltpu.CompilerParams(
            dimension_semantics=("parallel",)),
    )(x, prep["w_qkv"], prep["b_qkv"], prep["w_d"], prep["b_d"],
      prep["w_f"], prep["b_f"])

    return out[0, :, :num_classes]                                  # (S, C)


def _reference(x, params, *, num_heads):
    """Pure-JAX re-implementation of the PyTorch SABNPT forward (for verification)."""
    B, S, H = x.shape
    Dh = H // num_heads
    hi = jax.lax.Precision.HIGHEST

    def lin(v, w, b):
        return jnp.einsum("bsh,oh->bso", v, w, precision=hi) + b

    q = lin(x, params["wq"], params["bq"]).reshape(B, S, num_heads, Dh).transpose(0, 2, 1, 3)
    k = lin(x, params["wk"], params["bk"]).reshape(B, S, num_heads, Dh).transpose(0, 2, 1, 3)
    v = lin(x, params["wv"], params["bv"]).reshape(B, S, num_heads, Dh).transpose(0, 2, 1, 3)
    scores = jnp.einsum("bhqd,bhkd->bhqk", q, k, precision=hi) / math.sqrt(Dh)
    probs = jax.nn.softmax(scores, axis=-1)          # SABNPT: mask_identity=False
    ctx = jnp.einsum("bhqk,bhkd->bhqd", probs, v, precision=hi)
    ctx = ctx.transpose(0, 2, 1, 3).reshape(B, S, H)
    attn_out = lin(ctx, params["wd"], params["bd"])
    logits = jnp.einsum("bsh,oh->bso", attn_out, params["wf"], precision=hi) + params["bf"]
    sq = jnp.squeeze(logits)
    return jax.nn.log_softmax(sq, axis=1)


def make_params(key, hidden, dim_output):
    ks = jax.random.split(key, 10)
    s = 1.0 / math.sqrt(hidden)
    return {
        "wq": jax.random.uniform(ks[0], (hidden, hidden), jnp.float32, -s, s),
        "bq": jax.random.uniform(ks[1], (hidden,), jnp.float32, -s, s),
        "wk": jax.random.uniform(ks[2], (hidden, hidden), jnp.float32, -s, s),
        "bk": jax.random.uniform(ks[3], (hidden,), jnp.float32, -s, s),
        "wv": jax.random.uniform(ks[4], (hidden, hidden), jnp.float32, -s, s),
        "bv": jax.random.uniform(ks[5], (hidden,), jnp.float32, -s, s),
        "wd": jax.random.uniform(ks[6], (hidden, hidden), jnp.float32, -s, s),
        "bd": jax.random.uniform(ks[7], (hidden,), jnp.float32, -s, s),
        "wf": jax.random.uniform(ks[8], (dim_output, hidden), jnp.float32, -s, s),
        "bf": jax.random.uniform(ks[9], (dim_output,), jnp.float32, -s, s),
    }


if __name__ == "__main__":
    # Shapes consistent with the module defaults: batch=1 (NPT), seq=8,
    # dim_hidden=128, 4 heads (head_dim=32), dim_output=2.
    B, S, H, NH, C = 1, 8, 128, 4, 2
    key = jax.random.PRNGKey(0)
    kx, kp = jax.random.split(key)
    x = jax.random.normal(kx, (B, S, H), dtype=jnp.float32)
    params = make_params(kp, H, C)

    prep, num_classes = prepare_params(params, num_heads=NH)   # one-time packing
    out = sab_npt_forward(x, prep, num_classes=num_classes)
    out = jax.block_until_ready(out)

    ref = _reference(x, params, num_heads=NH)
    # approx reciprocal (EUP) in the softmax -> slightly looser tolerance than f32 exact
    np.testing.assert_allclose(np.asarray(out), np.asarray(ref), rtol=2e-3, atol=2e-3)

    print("KERNEL_OK")
</pallas_src>

<mosaic_0001>
module attributes {stable_mosaic.version = 11 : i64} {
  func.func @_sabnpt_kernel(%arg0: i32, %arg1: memref<1x8x128xf32, #tpu.memory_space<vmem>>, %arg2: memref<4x128x96xf32, #tpu.memory_space<vmem>>, %arg3: memref<4x1x96xf32, #tpu.memory_space<vmem>>, %arg4: memref<4x32x128xf32, #tpu.memory_space<vmem>>, %arg5: memref<1x128xf32, #tpu.memory_space<vmem>>, %arg6: memref<128x128xf32, #tpu.memory_space<vmem>>, %arg7: memref<1x128xf32, #tpu.memory_space<vmem>>, %arg8: memref<1x8x128xf32, #tpu.memory_space<vmem>>) attributes {dimension_semantics = [#tpu.dimension_semantics<parallel>], iteration_bounds = array<i64: 1>, scalar_prefetch = 0 : i64, scratch_operands = 0 : i64, tpu.core_type = #tpu.core_type<tc>, window_params = [{transform_indices = @transform_0, window_bounds = array<i64: 1, 8, 128>}, {pipeline_mode = #tpu.pipeline_mode<synchronous>, transform_indices = @transform_1, window_bounds = array<i64: 4, 128, 96>}, {pipeline_mode = #tpu.pipeline_mode<synchronous>, transform_indices = @transform_2, window_bounds = array<i64: 4, 1, 96>}, {pipeline_mode = #tpu.pipeline_mode<synchronous>, transform_indices = @transform_3, window_bounds = array<i64: 4, 32, 128>}, {pipeline_mode = #tpu.pipeline_mode<synchronous>, transform_indices = @transform_4, window_bounds = array<i64: 1, 128>}, {pipeline_mode = #tpu.pipeline_mode<synchronous>, transform_indices = @transform_5, window_bounds = array<i64: 128, 128>}, {pipeline_mode = #tpu.pipeline_mode<synchronous>, transform_indices = @transform_6, window_bounds = array<i64: 1, 128>}, {transform_indices = @transform_7, window_bounds = array<i64: 1, 8, 128>}]} {
    %c0 = arith.constant 0 : index
    %c0_0 = arith.constant 0 : index
    %c0_1 = arith.constant 0 : index
    %0 = vector.load %arg1[%c0, %c0_0, %c0_1] : memref<1x8x128xf32, #tpu.memory_space<vmem>>, vector<1x8x128xf32>
    %1 = vector.shape_cast %0 : vector<1x8x128xf32> to vector<8x128xf32>
    %2 = vector.shape_cast %1 : vector<8x128xf32> to vector<1x8x128xf32>
    %3 = vector.shape_cast %2 : vector<1x8x128xf32> to vector<1x8x128xf32>
    %4 = vector.broadcast %3 : vector<1x8x128xf32> to vector<4x8x128xf32>
    %c0_2 = arith.constant 0 : index
    %c0_3 = arith.constant 0 : index
    %c0_4 = arith.constant 0 : index
    %5 = vector.load %arg2[%c0_2, %c0_3, %c0_4] : memref<4x128x96xf32, #tpu.memory_space<vmem>>, vector<4x128x96xf32>
    "tpu.trace_start"() <{level = 10 : i32, message = "nsh,nhe->nse"}> : () -> ()
    %cst = arith.constant dense<0.000000e+00> : vector<4x8x96xf32>
    %6 = tpu.matmul %4, %5, %cst {dimension_numbers = #tpu.dot_dimension_numbers<[2], [1], [1], [2], [0, 0, 0, 1, 1, 2], [0], [0]>} : vector<4x8x128xf32>, vector<4x128x96xf32>, vector<4x8x96xf32> -> vector<4x8x96xf32>
    "tpu.trace_stop"() : () -> ()
    %c0_5 = arith.constant 0 : index
    %c0_6 = arith.constant 0 : index
    %c0_7 = arith.constant 0 : index
    %7 = vector.load %arg3[%c0_5, %c0_6, %c0_7] : memref<4x1x96xf32, #tpu.memory_space<vmem>>, vector<4x1x96xf32>
    %8 = vector.broadcast %7 : vector<4x1x96xf32> to vector<4x8x96xf32>
    %9 = arith.addf %6, %8 : vector<4x8x96xf32>
    %10 = vector.extract_strided_slice %9 {offsets = [0, 0, 0], sizes = [4, 8, 32], strides = [1, 1, 1]} : vector<4x8x96xf32> to vector<4x8x32xf32>
    %11 = vector.extract_strided_slice %9 {offsets = [0, 0, 32], sizes = [4, 8, 32], strides = [1, 1, 1]} : vector<4x8x96xf32> to vector<4x8x32xf32>
    %12 = vector.extract_strided_slice %9 {offsets = [0, 0, 64], sizes = [4, 8, 32], strides = [1, 1, 1]} : vector<4x8x96xf32> to vector<4x8x32xf32>
    "tpu.trace_start"() <{level = 10 : i32, message = "nqd,nkd->nqk"}> : () -> ()
    %cst_8 = arith.constant dense<0.000000e+00> : vector<4x8x8xf32>
    %13 = tpu.matmul %10, %11, %cst_8 {dimension_numbers = #tpu.dot_dimension_numbers<[2], [2], [1], [1], [0, 0, 0, 1, 1, 1], [0], [0]>} : vector<4x8x32xf32>, vector<4x8x32xf32>, vector<4x8x8xf32> -> vector<4x8x8xf32>
    "tpu.trace_stop"() : () -> ()
    %cst_9 = arith.constant 0.176776692 : f32
    %14 = vector.broadcast %cst_9 : f32 to vector<4x8x8xf32>
    %15 = arith.mulf %13, %14 : vector<4x8x8xf32>
    %cst_10 = arith.constant dense<0xFF800000> : vector<4x8xf32>
    %16 = vector.multi_reduction <maximumf>, %15, %cst_10 [2] : vector<4x8x8xf32> to vector<4x8xf32>
    %17 = vector.shape_cast %16 : vector<4x8xf32> to vector<4x8x1xf32>
    %18 = vector.broadcast %17 : vector<4x8x1xf32> to vector<4x8x8xf32>
    %19 = arith.subf %15, %18 : vector<4x8x8xf32>
    %20 = math.exp %19 : vector<4x8x8xf32>
    %cst_11 = arith.constant dense<0.000000e+00> : vector<4x8xf32>
    %21 = vector.multi_reduction <add>, %20, %cst_11 [2] : vector<4x8x8xf32> to vector<4x8xf32>
    %22 = vector.shape_cast %21 : vector<4x8xf32> to vector<4x8x1xf32>
    %23 = tpu.reciprocal %22 {approx = true} : vector<4x8x1xf32> -> vector<4x8x1xf32>
    %24 = vector.broadcast %23 : vector<4x8x1xf32> to vector<4x8x8xf32>
    %25 = arith.mulf %20, %24 : vector<4x8x8xf32>
    "tpu.trace_start"() <{level = 10 : i32, message = "nqk,nkd->nqd"}> : () -> ()
    %cst_12 = arith.constant dense<0.000000e+00> : vector<4x8x32xf32>
    %26 = tpu.matmul %25, %12, %cst_12 {dimension_numbers = #tpu.dot_dimension_numbers<[2], [1], [1], [2], [0, 0, 0, 1, 1, 2], [0], [0]>} : vector<4x8x8xf32>, vector<4x8x32xf32>, vector<4x8x32xf32> -> vector<4x8x32xf32>
    "tpu.trace_stop"() : () -> ()
    %c0_13 = arith.constant 0 : index
    %c0_14 = arith.constant 0 : index
    %c0_15 = arith.constant 0 : index
    %27 = vector.load %arg4[%c0_13, %c0_14, %c0_15] : memref<4x32x128xf32, #tpu.memory_space<vmem>>, vector<4x32x128xf32>
    "tpu.trace_start"() <{level = 10 : i32, message = "nsd,ndh->nsh"}> : () -> ()
    %cst_16 = arith.constant dense<0.000000e+00> : vector<4x8x128xf32>
    %28 = tpu.matmul %26, %27, %cst_16 {dimension_numbers = #tpu.dot_dimension_numbers<[2], [1], [1], [2], [0, 0, 0, 1, 1, 2], [0], [0]>} : vector<4x8x32xf32>, vector<4x32x128xf32>, vector<4x8x128xf32> -> vector<4x8x128xf32>
    "tpu.trace_stop"() : () -> ()
    %cst_17 = arith.constant dense<0.000000e+00> : vector<8x128xf32>
    %29 = vector.multi_reduction <add>, %28, %cst_17 [0] : vector<4x8x128xf32> to vector<8x128xf32>
    %c0_18 = arith.constant 0 : index
    %c0_19 = arith.constant 0 : index
    %30 = vector.load %arg5[%c0_18, %c0_19] : memref<1x128xf32, #tpu.memory_space<vmem>>, vector<1x128xf32>
    %31 = vector.broadcast %30 : vector<1x128xf32> to vector<8x128xf32>
    %32 = arith.addf %29, %31 : vector<8x128xf32>
    %c0_20 = arith.constant 0 : index
    %c0_21 = arith.constant 0 : index
    %33 = vector.load %arg6[%c0_20, %c0_21] : memref<128x128xf32, #tpu.memory_space<vmem>>, vector<128x128xf32>
    %cst_22 = arith.constant dense<0.000000e+00> : vector<8x128xf32>
    %34 = tpu.matmul %32, %33, %cst_22 {dimension_numbers = #tpu.dot_dimension_numbers<[1], [0], [0], [1], [0, 0, 1, 1], [], []>} : vector<8x128xf32>, vector<128x128xf32>, vector<8x128xf32> -> vector<8x128xf32>
    %c0_23 = arith.constant 0 : index
    %c0_24 = arith.constant 0 : index
    %35 = vector.load %arg7[%c0_23, %c0_24] : memref<1x128xf32, #tpu.memory_space<vmem>>, vector<1x128xf32>
    %36 = vector.broadcast %35 : vector<1x128xf32> to vector<8x128xf32>
    %37 = arith.addf %34, %36 : vector<8x128xf32>
    %38 = tpu.iota {dimensions = array<i32: 1>} : vector<8x128xi32>
    %c2_i32 = arith.constant 2 : i32
    %39 = vector.broadcast %c2_i32 : i32 to vector<8x128xi32>
    %40 = arith.cmpi slt, %38, %39 : vector<8x128xi32>
    %cst_25 = arith.constant -1.000000e+30 : f32
    %41 = vector.broadcast %cst_25 : f32 to vector<8x128xf32>
    %42 = arith.select %40, %37, %41 : vector<8x128xi1>, vector<8x128xf32>
    %cst_26 = arith.constant dense<0xFF800000> : vector<8xf32>
    %43 = vector.multi_reduction <maximumf>, %42, %cst_26 [1] : vector<8x128xf32> to vector<8xf32>
    %44 = vector.shape_cast %43 : vector<8xf32> to vector<8x1xf32>
    %45 = vector.broadcast %44 : vector<8x1xf32> to vector<8x128xf32>
    %46 = arith.subf %42, %45 : vector<8x128xf32>
    %47 = math.exp %46 : vector<8x128xf32>
    %cst_27 = arith.constant dense<0.000000e+00> : vector<8xf32>
    %48 = vector.multi_reduction <add>, %47, %cst_27 [1] : vector<8x128xf32> to vector<8xf32>
    %49 = vector.shape_cast %48 : vector<8xf32> to vector<8x1xf32>
    %50 = math.log %49 : vector<8x1xf32>
    %51 = arith.addf %50, %44 : vector<8x1xf32>
    %52 = vector.broadcast %51 : vector<8x1xf32> to vector<8x128xf32>
    %53 = arith.subf %42, %52 : vector<8x128xf32>
    %c0_28 = arith.constant 0 : index
    %c0_29 = arith.constant 0 : index
    %c0_30 = arith.constant 0 : index
    %54 = vector.load %arg8[%c0_28, %c0_29, %c0_30] : memref<1x8x128xf32, #tpu.memory_space<vmem>>, vector<1x8x128xf32>
    %55 = vector.shape_cast %54 : vector<1x8x128xf32> to vector<8x128xf32>
    %56 = vector.shape_cast %53 : vector<8x128xf32> to vector<1x8x128xf32>
    tpu.vector_store %arg8[%c0_28, %c0_29, %c0_30], %56 {strides = array<i32>} : memref<1x8x128xf32, #tpu.memory_space<vmem>>, vector<1x8x128xf32>,
    return
  }
  func.func @transform_0(%arg0: i32) -> (i32, i32, i32) {
    %c0_i32 = arith.constant 0 : i32
    %c0_i32_0 = arith.constant 0 : i32
    %c0_i32_1 = arith.constant 0 : i32
    return %arg0, %c0_i32, %c0_i32_0 : i32, i32, i32
  }
  func.func @transform_1(%arg0: i32) -> (i32, i32, i32) {
    %c0_i32 = arith.constant 0 : i32
    %c0_i32_0 = arith.constant 0 : i32
    %c0_i32_1 = arith.constant 0 : i32
    %c0_i32_2 = arith.constant 0 : i32
    return %c0_i32, %c0_i32_0, %c0_i32_1 : i32, i32, i32
  }
  func.func @transform_2(%arg0: i32) -> (i32, i32, i32) {
    %c0_i32 = arith.constant 0 : i32
    %c0_i32_0 = arith.constant 0 : i32
    %c0_i32_1 = arith.constant 0 : i32
    %c0_i32_2 = arith.constant 0 : i32
    return %c0_i32, %c0_i32_0, %c0_i32_1 : i32, i32, i32
  }
  func.func @transform_3(%arg0: i32) -> (i32, i32, i32) {
    %c0_i32 = arith.constant 0 : i32
    %c0_i32_0 = arith.constant 0 : i32
    %c0_i32_1 = arith.constant 0 : i32
    %c0_i32_2 = arith.constant 0 : i32
    return %c0_i32, %c0_i32_0, %c0_i32_1 : i32, i32, i32
  }
  func.func @transform_4(%arg0: i32) -> (i32, i32) {
    %c0_i32 = arith.constant 0 : i32
    %c0_i32_0 = arith.constant 0 : i32
    %c0_i32_1 = arith.constant 0 : i32
    return %c0_i32, %c0_i32_0 : i32, i32
  }
  func.func @transform_5(%arg0: i32) -> (i32, i32) {
    %c0_i32 = arith.constant 0 : i32
    %c0_i32_0 = arith.constant 0 : i32
    %c0_i32_1 = arith.constant 0 : i32
    return %c0_i32, %c0_i32_0 : i32, i32
  }
  func.func @transform_6(%arg0: i32) -> (i32, i32) {
    %c0_i32 = arith.constant 0 : i32
    %c0_i32_0 = arith.constant 0 : i32
    %c0_i32_1 = arith.constant 0 : i32
    return %c0_i32, %c0_i32_0 : i32, i32
  }
  func.func @transform_7(%arg0: i32) -> (i32, i32, i32) {
    %c0_i32 = arith.constant 0 : i32
    %c0_i32_0 = arith.constant 0 : i32
    %c0_i32_1 = arith.constant 0 : i32
    return %arg0, %c0_i32, %c0_i32_0 : i32, i32, i32
  }
}

</mosaic_0001>

<bundles_post_ra>
// kernel: sab_npt_forward.1
= control target key start
LH: loop header
LB: loop body
LE: loop exit
PB: predicated region body
PF: predicated region fallthrough
CT: control target
= control target key end

     0   :  { %v1919_v0 = vmov 0.0   ;;  %vm1920_vm0 = vmmov 0   ;;  %s1921_s16 = smov 96   ;;  %vm402_vm1 = vcmask 261120   ;;  %vm712_vm2 = vcmask 64512   ;;  %s2463_s1 = inlined_call_operand.vmem [shape: f32[4,128,96], index: 1, kind: input, shape index: {}]   ;;  %s2464_s0 = inlined_call_operand.vmem [shape: f32[1,8,128], index: 0, kind: input, shape index: {}]   ;;  %s2465_s2 = inlined_call_operand.vmem [shape: f32[4,1,96], index: 2, kind: input, shape index: {}]   ;;  %s2466_s3 = inlined_call_operand.vmem [shape: f32[4,32,128], index: 3, kind: input, shape index: {}]   ;;  %s2467_s5 = inlined_call_operand.vmem [shape: f32[128,128], index: 5, kind: input, shape index: {}]   ;;  %s2468_s4 = inlined_call_operand.vmem [shape: f32[1,128], index: 4, kind: input, shape index: {}]   ;;  %s2469_s6 = inlined_call_operand.vmem [shape: f32[1,128], index: 6, kind: input, shape index: {}]   ;;  %s2470_s7 = inlined_call_operand.vmem [shape: f32[1,8,128], index: 7, kind: output, shape index: {}]  }
   0x1   :  { %1636 = vmatprep.subr.mxu0 %v1919_v0  ;;  %v42_v1 = vld [vmem:[%s2463_s1 + $0x78] sm:$0xff]  ;;  %v41_v2 = vld [vmem:[%s2463_s1 + $0x70] sm:$0xff]  ;;  %1671 = vmatprep.subr.mxu1 %v1919_v0  ;;  %v40_v5 = vld [vmem:[%s2463_s1 + $0x68] sm:$0xff] }
   0x2   :  { %1637 = vmatpush3.msra.mxu0 %v42_v1  ;;  %v58_v3 = vld [vmem:[%s2463_s1 + $0xf8] sm:$0xff]  ;;  %v57_v4 = vld [vmem:[%s2463_s1 + $0xf0] sm:$0xff]  ;;  %1668 = vmatprep.mubr.msk.f32.mxu0 %vm1920_vm0, %v1919_v0  ;;  %v56_v6 = vld [vmem:[%s2463_s1 + $0xe8] sm:$0xff] }
   0x3   :  { %1638 = vmatprep.subr.mxu0 %v1919_v0  ;;  %1672 = vmatpush3.msra.mxu1 %v58_v3  ;;  %v39_v7 = vld [vmem:[%s2463_s1 + $0x60] sm:$0xff]  ;;  %v38_v9 = vld [vmem:[%s2463_s1 + $0x58] sm:$0xff]  ;;  %v37_v11 = vld [vmem:[%s2463_s1 + $0x50] sm:$0xff] }
   0x4   :  { %1639 = vmatpush3.msra.mxu0 %v41_v2  ;;  %1673 = vmatprep.subr.mxu1 %v1919_v0  ;;  %v55_v8 = vld [vmem:[%s2463_s1 + $0xe0] sm:$0xff]  ;;  %v54_v10 = vld [vmem:[%s2463_s1 + $0xd8] sm:$0xff]  ;;  %v53_v12 = vld [vmem:[%s2463_s1 + $0xd0] sm:$0xff] }
   0x5   :  { %1640 = vmatprep.subr.mxu0 %v1919_v0  ;;  %1674 = vmatpush3.msra.mxu1 %v57_v4  ;;  %v36_v13 = vld [vmem:[%s2463_s1 + $0x48] sm:$0xff]  ;;  %v35_v15 = vld [vmem:[%s2463_s1 + $0x40] sm:$0xff]  ;;  %v34_v17 = vld [vmem:[%s2463_s1 + $0x38] sm:$0xff] }
   0x6   :  { %1641 = vmatpush3.msra.mxu0 %v40_v5  ;;  %1675 = vmatprep.subr.mxu1 %v1919_v0  ;;  %v52_v14 = vld [vmem:[%s2463_s1 + $0xc8] sm:$0xff]  ;;  %v51_v16 = vld [vmem:[%s2463_s1 + $0xc0] sm:$0xff]  ;;  %v50_v18 = vld [vmem:[%s2463_s1 + $0xb8] sm:$0xff] }
   0x7   :  { %1642 = vmatprep.subr.mxu0 %v1919_v0  ;;  %1676 = vmatpush3.msra.mxu1 %v56_v6  ;;  %v33_v19 = vld [vmem:[%s2463_s1 + $0x30] sm:$0xff]  ;;  %v32_v21 = vld [vmem:[%s2463_s1 + $0x28] sm:$0xff]  ;;  %v31_v23 = vld [vmem:[%s2463_s1 + $0x20] sm:$0xff] }
   0x8   :  { %1643 = vmatpush3.msra.mxu0 %v39_v7  ;;  %1677 = vmatprep.subr.mxu1 %v1919_v0  ;;  %v49_v20 = vld [vmem:[%s2463_s1 + $0xb0] sm:$0xff]  ;;  %v48_v22 = vld [vmem:[%s2463_s1 + $0xa8] sm:$0xff]  ;;  %v47_v24 = vld [vmem:[%s2463_s1 + $0xa0] sm:$0xff] }
   0x9   :  { %1644 = vmatprep.subr.mxu0 %v1919_v0  ;;  %1678 = vmatpush3.msra.mxu1 %v55_v8  ;;  %v30_v25 = vld [vmem:[%s2463_s1 + $0x18] sm:$0xff]  ;;  %v29_v27 = vld [vmem:[%s2463_s1 + $0x10] sm:$0xff]  ;;  %v28_v29 = vld [vmem:[%s2463_s1 + $0x8] sm:$0xff] }
   0xa   :  { %1645 = vmatpush3.msra.mxu0 %v38_v9  ;;  %1679 = vmatprep.subr.mxu1 %v1919_v0  ;;  %v46_v26 = vld [vmem:[%s2463_s1 + $0x98] sm:$0xff]  ;;  %v45_v28 = vld [vmem:[%s2463_s1 + $0x90] sm:$0xff]  ;;  %v44_v30 = vld [vmem:[%s2463_s1 + $0x88] sm:$0xff] }
   0xb   :  { %1646 = vmatprep.subr.mxu0 %v1919_v0  ;;  %1680 = vmatpush3.msra.mxu1 %v54_v10  ;;  %v27_v31 = vld [vmem:[%s2463_s1] sm:$0xff]  ;;  %v74_v33 = vld [vmem:[%s2463_s1 + $0x178] sm:$0xff]  ;;  %v73_v35 = vld [vmem:[%s2463_s1 + $0x170] sm:$0xff] }
   0xc   :  { %1647 = vmatpush3.msra.mxu0 %v37_v11  ;;  %1681 = vmatprep.subr.mxu1 %v1919_v0  ;;  %v2090_v32 = vld [vmem:[%s2464_s0] sm:$0xff]  ;;  %v72_v36 = vld [vmem:[%s2463_s1 + $0x168] sm:$0xff]  ;;  %v90_v37 = vld [vmem:[%s2463_s1 + $0x1f8] sm:$0xff] }
   0xd   :  { %1648 = vmatprep.subr.mxu0 %v1919_v0  ;;  %1682 = vmatpush3.msra.mxu1 %v53_v12  ;;  %v43_v34 = vld [vmem:[%s2463_s1 + $0x80] sm:$0xff]  ;;  %v89_v39 = vld [vmem:[%s2463_s1 + $0x1f0] sm:$0xff]  ;;  %v70_v40 = vld [vmem:[%s2463_s1 + $0x158] sm:$0xff] }
   0xe   :  { %1649 = vmatpush3.msra.mxu0 %v36_v13  ;;  %1683 = vmatprep.subr.mxu1 %v1919_v0  ;;  %v71_v38 = vld [vmem:[%s2463_s1 + $0x160] sm:$0xff]  ;;  %v88_v41 = vld [vmem:[%s2463_s1 + $0x1e8] sm:$0xff]  ;;  %v69_v42 = vld [vmem:[%s2463_s1 + $0x150] sm:$0xff] }
   0xf   :  { %1650 = vmatprep.subr.mxu0 %v1919_v0  ;;  %1684 = vmatpush3.msra.mxu1 %v52_v14  ;;  %v87_v43 = vld [vmem:[%s2463_s1 + $0x1e0] sm:$0xff]  ;;  %v68_v44 = vld [vmem:[%s2463_s1 + $0x148] sm:$0xff]  ;;  %v86_v45 = vld [vmem:[%s2463_s1 + $0x1d8] sm:$0xff] }
  0x10   :  { %1651 = vmatpush3.msra.mxu0 %v35_v15  ;;  %1685 = vmatprep.subr.mxu1 %v1919_v0  ;;  %v67_v46 = vld [vmem:[%s2463_s1 + $0x140] sm:$0xff]  ;;  %v85_v47 = vld [vmem:[%s2463_s1 + $0x1d0] sm:$0xff]  ;;  %v66_v48 = vld [vmem:[%s2463_s1 + $0x138] sm:$0xff] }
  0x11   :  { %1652 = vmatprep.subr.mxu0 %v1919_v0  ;;  %1686 = vmatpush3.msra.mxu1 %v51_v16  ;;  %v84_v49 = vld [vmem:[%s2463_s1 + $0x1c8] sm:$0xff]  ;;  %v65_v50 = vld [vmem:[%s2463_s1 + $0x130] sm:$0xff]  ;;  %v83_v51 = vld [vmem:[%s2463_s1 + $0x1c0] sm:$0xff] }
  0x12   :  { %1653 = vmatpush3.msra.mxu0 %v34_v17  ;;  %1687 = vmatprep.subr.mxu1 %v1919_v0  ;;  %v64_v52 = vld [vmem:[%s2463_s1 + $0x128] sm:$0xff]  ;;  %v82_v53 = vld [vmem:[%s2463_s1 + $0x1b8] sm:$0xff]  ;;  %v63_v54 = vld [vmem:[%s2463_s1 + $0x120] sm:$0xff] }
  0x13   :  { %1654 = vmatprep.subr.mxu0 %v1919_v0  ;;  %1688 = vmatpush3.msra.mxu1 %v50_v18  ;;  %v81_v55 = vld [vmem:[%s2463_s1 + $0x1b0] sm:$0xff]  ;;  %v62_v56 = vld [vmem:[%s2463_s1 + $0x118] sm:$0xff]  ;;  %v80_v57 = vld [vmem:[%s2463_s1 + $0x1a8] sm:$0xff] }
  0x14   :  { %1655 = vmatpush3.msra.mxu0 %v33_v19  ;;  %1689 = vmatprep.subr.mxu1 %v1919_v0  ;;  %v61_v58 = vld [vmem:[%s2463_s1 + $0x110] sm:$0xff]  ;;  %v79_v59 = vld [vmem:[%s2463_s1 + $0x1a0] sm:$0xff]  ;;  %v60_v60 = vld [vmem:[%s2463_s1 + $0x108] sm:$0xff] }
  0x15   :  { %1656 = vmatprep.subr.mxu0 %v1919_v0  ;;  %1690 = vmatpush3.msra.mxu1 %v49_v20  ;;  %v78_v61 = vld [vmem:[%s2463_s1 + $0x198] sm:$0xff]  ;;  %v59_v62 = vld [vmem:[%s2463_s1 + $0x100] sm:$0xff]  ;;  %v77_v63 = vld [vmem:[%s2463_s1 + $0x190] sm:$0xff] }
  0x16   :  { %1657 = vmatpush3.msra.mxu0 %v32_v21  ;;  %1691 = vmatprep.subr.mxu1 %v1919_v0  ;;  %v76_v1 = vld [vmem:[%s2463_s1 + $0x188] sm:$0xff]  ;;  %v75_v2 = vld [vmem:[%s2463_s1 + $0x180] sm:$0xff] }
  0x17   :  { %1658 = vmatprep.subr.mxu0 %v1919_v0  ;;  %1692 = vmatpush3.msra.mxu1 %v48_v22  ;;  %v1493_v3 = vld [vmem:[%s2465_s2] ss:$0 sm:$0xff]  ;;  %v1494_v6 = vld [vmem:[%s2465_s2 + $0x1] ss:$0 sm:$0xff]  ;;  %v1495_v11 = vld [vmem:[%s2465_s2 + $0x2] ss:$0 sm:$0xff] }
  0x18   :  { %1659 = vmatpush3.msra.mxu0 %v31_v23  ;;  %1693 = vmatprep.subr.mxu1 %v1919_v0  ;;  %v1496_v15 = vld [vmem:[%s2465_s2 + $0x3] ss:$0 sm:$0xff]  ;;  %s1922_s2 = smov 64  }
  0x19   :  { %1660 = vmatprep.subr.mxu0 %v1919_v0  ;;  %1694 = vmatpush3.msra.mxu1 %v47_v24 }
  0x1a   :  { %1661 = vmatpush3.msra.mxu0 %v30_v25  ;;  %1695 = vmatprep.subr.mxu1 %v1919_v0 }
  0x1b   :  { %1662 = vmatprep.subr.mxu0 %v1919_v0  ;;  %1696 = vmatpush3.msra.mxu1 %v46_v26 }
  0x1c   :  { %1663 = vmatpush3.msra.mxu0 %v29_v27  ;;  %1697 = vmatprep.subr.mxu1 %v1919_v0 }
  0x1d   :  { %1664 = vmatprep.subr.mxu0 %v1919_v0  ;;  %1698 = vmatpush3.msra.mxu1 %v45_v28 }
  0x1e   :  { %1665 = vmatpush3.msra.mxu0 %v28_v29  ;;  %1699 = vmatprep.subr.mxu1 %v1919_v0 }
  0x1f   :  { %1666 = vmatprep.subr.mxu0 %v1919_v0  ;;  %1700 = vmatpush3.msra.mxu1 %v44_v30 }
  0x20   :  { %1667 = vmatpush3.msra.mxu0 %v27_v31  ;;  %1701 = vmatprep.subr.mxu1 %v1919_v0 }
  0x21   :  { %1669 = vmatmul.mubr.f32.vlgmr.msra.gmra.mxu0 %v2090_v32  ;;  %1706 = vmatprep.subr.mxu0 %v1919_v0 }
  0x22   :  { %1707 = vmatpush3.msra.mxu0 %v74_v33  ;;  %1702 = vmatpush3.msra.mxu1 %v43_v34 }
  0x23   :  { %1708 = vmatprep.subr.mxu0 %v1919_v0  ;;  %1703 = vmatprep.mubr.msk.f32.mxu1 %vm1920_vm0, %v1919_v0 }
  0x24   :  { %1709 = vmatpush3.msra.mxu0 %v73_v35  ;;  %1704 = vmatmul.mubr.f32.vlgmr.msra.gmra.mxu1 %v2090_v32 }
  0x25   :  { %1710 = vmatprep.subr.mxu0 %v1919_v0  ;;  %1741 = vmatprep.subr.mxu1 %v1919_v0 }
  0x26   :  { %1711 = vmatpush3.msra.mxu0 %v72_v36  ;;  %1742 = vmatpush3.msra.mxu1 %v90_v37 }
  0x27   :  { %1712 = vmatprep.subr.mxu0 %v1919_v0  ;;  %1743 = vmatprep.subr.mxu1 %v1919_v0 }
  0x28   :  { %1713 = vmatpush3.msra.mxu0 %v71_v38  ;;  %1744 = vmatpush3.msra.mxu1 %v89_v39 }
  0x29   :  { %1714 = vmatprep.subr.mxu0 %v1919_v0  ;;  %1745 = vmatprep.subr.mxu1 %v1919_v0 }
  0x2a   :  { %1715 = vmatpush3.msra.mxu0 %v70_v40  ;;  %1746 = vmatpush3.msra.mxu1 %v88_v41 }
  0x2b   :  { %1716 = vmatprep.subr.mxu0 %v1919_v0  ;;  %1747 = vmatprep.subr.mxu1 %v1919_v0 }
  0x2c   :  { %1717 = vmatpush3.msra.mxu0 %v69_v42  ;;  %1748 = vmatpush3.msra.mxu1 %v87_v43 }
  0x2d   :  { %1718 = vmatprep.subr.mxu0 %v1919_v0  ;;  %1749 = vmatprep.subr.mxu1 %v1919_v0 }
  0x2e   :  { %1719 = vmatpush3.msra.mxu0 %v68_v44  ;;  %1750 = vmatpush3.msra.mxu1 %v86_v45 }
  0x2f   :  { %1720 = vmatprep.subr.mxu0 %v1919_v0  ;;  %1751 = vmatprep.subr.mxu1 %v1919_v0 }
  0x30   :  { %1721 = vmatpush3.msra.mxu0 %v67_v46  ;;  %1752 = vmatpush3.msra.mxu1 %v85_v47 }
  0x31   :  { %1722 = vmatprep.subr.mxu0 %v1919_v0  ;;  %1753 = vmatprep.subr.mxu1 %v1919_v0 }
  0x32   :  { %1723 = vmatpush3.msra.mxu0 %v66_v48  ;;  %1754 = vmatpush3.msra.mxu1 %v84_v49 }
  0x33   :  { %1724 = vmatprep.subr.mxu0 %v1919_v0  ;;  %1755 = vmatprep.subr.mxu1 %v1919_v0 }
  0x34   :  { %1725 = vmatpush3.msra.mxu0 %v65_v50  ;;  %1756 = vmatpush3.msra.mxu1 %v83_v51 }
  0x35   :  { %1726 = vmatprep.subr.mxu0 %v1919_v0  ;;  %1757 = vmatprep.subr.mxu1 %v1919_v0 }
  0x36   :  { %1727 = vmatpush3.msra.mxu0 %v64_v52  ;;  %1758 = vmatpush3.msra.mxu1 %v82_v53 }
  0x37   :  { %1728 = vmatprep.subr.mxu0 %v1919_v0  ;;  %1759 = vmatprep.subr.mxu1 %v1919_v0 }
  0x38   :  { %1729 = vmatpush3.msra.mxu0 %v63_v54  ;;  %1760 = vmatpush3.msra.mxu1 %v81_v55 }
  0x39   :  { %1730 = vmatprep.subr.mxu0 %v1919_v0  ;;  %1761 = vmatprep.subr.mxu1 %v1919_v0 }
  0x3a   :  { %1731 = vmatpush3.msra.mxu0 %v62_v56  ;;  %1762 = vmatpush3.msra.mxu1 %v80_v57 }
  0x3b   :  { %1732 = vmatprep.subr.mxu0 %v1919_v0  ;;  %1763 = vmatprep.subr.mxu1 %v1919_v0 }
  0x3c   :  { %1733 = vmatpush3.msra.mxu0 %v61_v58  ;;  %1764 = vmatpush3.msra.mxu1 %v79_v59 }
  0x3d   :  { %1734 = vmatprep.subr.mxu0 %v1919_v0  ;;  %1765 = vmatprep.subr.mxu1 %v1919_v0 }
  0x3e   :  { %1735 = vmatpush3.msra.mxu0 %v60_v60  ;;  %1766 = vmatpush3.msra.mxu1 %v78_v61 }
  0x3f   :  { %1736 = vmatprep.subr.mxu0 %v1919_v0  ;;  %1767 = vmatprep.subr.mxu1 %v1919_v0 }
  0x40   :  { %1737 = vmatpush3.msra.mxu0 %v59_v62  ;;  %1738 = vmatprep.mubr.msk.f32.mxu0 %vm1920_vm0, %v1919_v0 }
  0x41   :  { %1768 = vmatpush3.msra.mxu1 %v77_v63  ;;  %1739 = vmatmul.mubr.f32.vlgmr.msra.gmra.mxu0 %v2090_v32 }
  0x42   :  { %1769 = vmatprep.subr.mxu1 %v1919_v0  ;;  %1773 = vmatprep.mubr.msk.f32.mxu1 %vm1920_vm0, %v1919_v0 }
  0x43   :  { %1770 = vmatpush3.msra.mxu1 %v76_v1  ;;  %1776 = vmatprep.subr.mxu0 %v1919_v0 }
  0x44   :  { %1771 = vmatprep.subr.mxu1 %v1919_v0  ;;  %1778 = vmatprep.mubr.msk.f32.mxu0 %vm1920_vm0, %v1919_v0 }
  0x45   :  { %1772 = vmatpush3.msra.mxu1 %v75_v2 }
  0x46   :  { %1774 = vmatmul.mubr.f32.vlgmr.msra.gmra.mxu1 %v2090_v32  ;;  %1781 = vmatprep.subr.mxu1 %v1919_v0 }
  0x47   :  { %1783 = vmatprep.mubr.msk.f32.mxu1 %vm1920_vm0, %v1919_v0 }
  0xe1   :  { %v185_v4 = vpop.f32.mrf.mxu0 }
  0xe2   :  { %v2245_v5 = vadd.f32 %v1493_v3, %v185_v4 }
  0xe3   :  { %v1670_v7 = vpop.f32.mrf.mxu0 }
  0xe4   :  { %400 = vrot.lane.b32.xlu0 %v2245_v5, %s1921_s16  ;;  %v255_v8 = vpop.f32.mrf.mxu1 }
  0xe5   :  { %v2251_v9 = vadd.f32 %v1494_v6, %v255_v8 }
  0xe6   :  { %v1705_v10 = vpop.f32.mrf.mxu1 }
  0xe7   :  { %v1064_v10 = vld [vmem:[%s2466_s3 + $0x18] sm:$0xff] }
  0xe8   :  { %478 = vrot.lane.b32.xlu0 %v2251_v9, %s1921_s16 }
 0x101   :  { %v325_v12 = vpop.f32.mrf.mxu0 }
 0x102   :  { %v2257_v13 = vadd.f32 %v1495_v11, %v325_v12  ;;  %v1063_v11 = vld [vmem:[%s2466_s3 + $0x10] sm:$0xff]  ;;  %v1062_v12 = vld [vmem:[%s2466_s3 + $0x8] sm:$0xff] }
 0x103   :  { %v1740_v14 = vpop.f32.mrf.mxu0 }
 0x104   :  { %555 = vrot.lane.b32.xlu1 %v2257_v13, %s1921_s16 }
 0x106   :  { %v395_v16 = vpop.f32.mrf.mxu1 }
 0x107   :  { %v2263_v17 = vadd.f32 %v1496_v15, %v395_v16  ;;  %v1061_v15 = vld [vmem:[%s2466_s3] sm:$0xff]  ;;  %v1068_v16 = vld [vmem:[%s2466_s3 + $0x38] sm:$0xff] }
 0x108   :  { %v1775_v18 = vpop.f32.mrf.mxu1 }
 0x109   :  { %632 = vrot.lane.b32.xlu1 %v2263_v17, %s1921_s16  ;;  %v1067_v18 = vld [vmem:[%s2466_s3 + $0x30] sm:$0xff] }
 0x156   :  { %v401_v19 = vpop.permute.xlu0 %400 }
 0x157   :  { %1777 = vmatpush3.xpose.msk.msra.mxu0 %vm402_vm1, %v401_v19 }
 0x158   :  { %1786 = vmatprep.subr.mxu0 %v1919_v0 }
 0x15a   :  { %1779 = vmatmul.mubr.msk.f32.vlgmr.msra.gmra.mxu0 %vm402_vm1, %v2245_v5  ;;  %v479_v20 = vpop.permute.xlu0 %478 }
 0x15b   :  { %1782 = vmatpush3.xpose.msk.msra.mxu1 %vm402_vm1, %v479_v20  ;;  %1788 = vmatprep.mubr.msk.f32.mxu0 %vm1920_vm0, %v1919_v0  ;;  %v1066_v20 = vld [vmem:[%s2466_s3 + $0x28] sm:$0xff] }
 0x15c   :  { %1791 = vmatprep.subr.mxu1 %v1919_v0 }
 0x15e   :  { %1784 = vmatmul.mubr.msk.f32.vlgmr.msra.gmra.mxu1 %vm402_vm1, %v2251_v9 }
 0x15f   :  { %1793 = vmatprep.mubr.msk.f32.mxu1 %vm1920_vm0, %v1919_v0 }
 0x176   :  { %v556_v21 = vpop.permute.xlu1 %555 }
 0x177   :  { %1787 = vmatpush3.xpose.msk.msra.mxu0 %vm402_vm1, %v556_v21  ;;  %v1065_v21 = vld [vmem:[%s2466_s3 + $0x20] sm:$0xff] }
 0x178   :  { %1796 = vmatprep.subr.mxu0 %v1919_v0 }
 0x17a   :  { %1789 = vmatmul.mubr.msk.f32.vlgmr.msra.gmra.mxu0 %vm402_vm1, %v2257_v13 }
 0x17b   :  { %v633_v22 = vpop.permute.xlu1 %632  ;;  %1798 = vmatprep.mubr.msk.f32.mxu0 %vm1920_vm0, %v1919_v0 }
 0x17c   :  { %1792 = vmatpush3.xpose.msk.msra.mxu1 %vm402_vm1, %v633_v22  ;;  %v1072_v22 = vld [vmem:[%s2466_s3 + $0x58] sm:$0xff] }
 0x17d   :  { %1801 = vmatprep.subr.mxu1 %v1919_v0 }
 0x17f   :  { %1794 = vmatmul.mubr.msk.f32.vlgmr.msra.gmra.mxu1 %vm402_vm1, %v2263_v17 }
 0x180   :  { %1803 = vmatprep.mubr.msk.f32.mxu1 %vm1920_vm0, %v1919_v0 }
 0x21a   :  { %v473_v23 = vpop.f32.mrf.mxu0 }
 0x21b   :  { %v708_v24 = vmul.f32 0.17677669, %v473_v23 }
 0x21c   :  { %v1780_v25 = vpop.f32.mrf.mxu0 }
 0x21d   :  { %v713_v26 = vsel %vm712_vm2, %v708_v24, -inf }
 0x21e   :  { %v550_v27 = vpop.f32.mrf.mxu1  ;;  %714 = vmax.xlane.f32.xlu0 %v713_v26  ;;  %v1070_v26 = vld [vmem:[%s2466_s3 + $0x48] sm:$0xff] }
 0x21f   :  { %v709_v28 = vmul.f32 0.17677669, %v550_v27  ;;  %v1069_v27 = vld [vmem:[%s2466_s3 + $0x40] sm:$0xff] }
 0x220   :  { %v1785_v29 = vpop.f32.mrf.mxu1 }
 0x221   :  { %v716_v30 = vsel %vm712_vm2, %v709_v28, -inf }
 0x222   :  { %717 = vmax.xlane.f32.xlu1 %v716_v30  ;;  %v1076_v30 = vld [vmem:[%s2466_s3 + $0x78] sm:$0xff] }
 0x23a   :  { %v627_v31 = vpop.f32.mrf.mxu0 }
 0x23b   :  { %v710_v32 = vmul.f32 0.17677669, %v627_v31 }
 0x23c   :  { %v1790_v33 = vpop.f32.mrf.mxu0 }
 0x23d   :  { %v719_v34 = vsel %vm712_vm2, %v710_v32, -inf }
 0x23e   :  { %720 = vmax.xlane.f32.xlu0 %v719_v34  ;;  %v1074_v34 = vld [vmem:[%s2466_s3 + $0x68] sm:$0xff] }
 0x23f   :  { %v704_v35 = vpop.f32.mrf.mxu1 }
 0x240   :  { %v711_v36 = vmul.f32 0.17677669, %v704_v35  ;;  %v1073_v35 = vld [vmem:[%s2466_s3 + $0x60] sm:$0xff] }
 0x241   :  { %v1795_v37 = vpop.f32.mrf.mxu1 }
 0x242   :  { %v722_v38 = vsel %vm712_vm2, %v711_v36, -inf  ;;  %v1394_v37 = vld [vmem:[%s2467_s5 + $0x70] sm:$0xff] }
 0x243   :  { %723 = vmax.xlane.f32.xlu0 %v722_v38  ;;  %v1393_v38 = vld [vmem:[%s2467_s5 + $0x68] sm:$0xff] }
 0x2a7   :  { %v715_v39 = vpop.xlane.xlu0 %714 }
 0x2a8   :  { %v725_v40 = vsub.f32 %v708_v24, %v715_v39  ;;  %v1071_v24 = vld [vmem:[%s2466_s3 + $0x50] sm:$0xff]  ;;  %v1392_v39 = vld [vmem:[%s2467_s5 + $0x60] sm:$0xff] }
 0x2aa   :  { %v729_v41 = vmul.f32 1.442695, %v725_v40  ;;  %v1391_v40 = vld [vmem:[%s2467_s5 + $0x58] sm:$0xff] }
 0x2ab   :  { %v718_v42 = vpop.xlane.xlu1 %717 }
 0x2ac   :  { %1899 = vpow2.f32 %v729_v41  ;;  %v726_v43 = vsub.f32 %v709_v28, %v718_v42  ;;  %v1390_v41 = vld [vmem:[%s2467_s5 + $0x50] sm:$0xff]  ;;  %v1389_v42 = vld [vmem:[%s2467_s5 + $0x48] sm:$0xff] }
 0x2ae   :  { %v731_v44 = vmul.f32 1.442695, %v726_v43  ;;  %v1388_v43 = vld [vmem:[%s2467_s5 + $0x40] sm:$0xff] }
 0x2b0   :  { %1901 = vpow2.f32 %v731_v44  ;;  %v1387_v44 = vld [vmem:[%s2467_s5 + $0x38] sm:$0xff] }
 0x2b9   :  { %v1900_v45 = vpop.eup %1899 }
 0x2ba   :  { %v737_v46 = vsel %vm712_vm2, %v1900_v45, 0.0 }
 0x2bb   :  { %738 = vadd.xlane.f32.xlu1 %v737_v46  ;;  %v1385_v46 = vld [vmem:[%s2467_s5 + $0x28] sm:$0xff] }
 0x2bd   :  { %v1902_v47 = vpop.eup %1901 }
 0x2be   :  { %v740_v48 = vsel %vm712_vm2, %v1902_v47, 0.0 }
 0x2bf   :  { %741 = vadd.xlane.f32.xlu0 %v740_v48  ;;  %v1383_v48 = vld [vmem:[%s2467_s5 + $0x18] sm:$0xff] }
 0x2c7   :  { %v721_v49 = vpop.xlane.xlu0 %720 }
 0x2c8   :  { %v727_v53 = vsub.f32 %v710_v32, %v721_v49  ;;  %v1075_v32 = vld [vmem:[%s2466_s3 + $0x70] sm:$0xff] }
 0x2c9   :  { %v1382_v49 = vld [vmem:[%s2467_s5 + $0x10] sm:$0xff] }
 0x2ca   :  { %v733_v54 = vmul.f32 1.442695, %v727_v53 }
 0x2cc   :  { %v724_v50 = vpop.xlane.xlu0 %723  ;;  %757 = vrot.lane.b32.xlu1 %v2245_v5, %s1922_s2 }
 0x2cd   :  { %v728_v51 = vsub.f32 %v711_v36, %v724_v50  ;;  %v1395_v36 = vld [vmem:[%s2467_s5 + $0x78] sm:$0xff]  ;;  %v1381_v50 = vld [vmem:[%s2467_s5 + $0x8] sm:$0xff] }
 0x2cf   :  { %v735_v52 = vmul.f32 1.442695, %v728_v51  ;;  %v1380_v51 = vld [vmem:[%s2467_s5] sm:$0xff] }
 0x2d1   :  { %1903 = vpow2.f32 %v735_v52 }
 0x2d2   :  { %1905 = vpow2.f32 %v733_v54 }
 0x2de   :  { %v1904_v55 = vpop.eup %1903 }
 0x2df   :  { %v746_v56 = vsel %vm712_vm2, %v1904_v55, 0.0  ;;  %v1906_v57 = vpop.eup %1905 }
 0x2e0   :  { %747 = vadd.xlane.f32.xlu0 %v746_v56  ;;  %v743_v58 = vsel %vm712_vm2, %v1906_v57, 0.0 }
 0x2f0   :  { %744 = vadd.xlane.f32.xlu1 %v743_v58 }
 0x2f6   :  { %833 = vrot.lane.b32.xlu0 %v2251_v9, %s1922_s2 }
 0x301   :  { %909 = vrot.lane.b32.xlu1 %v2257_v13, %s1922_s2 }
 0x305   :  { %985 = vrot.lane.b32.xlu1 %v2263_v17, %s1922_s2 }
 0x344   :  { %v739_v59 = vpop.xlane.xlu1 %738 }
 0x345   :  { %1907 = vrcp.f32 %v739_v59 }
 0x348   :  { %v758_v60 = vpop.permute.xlu1 %757  ;;  %v742_v63 = vpop.xlane.xlu0 %741 }
 0x349   :  { %1797 = vmatpush3.msra.mxu0 %v758_v60  ;;  %1909 = vrcp.f32 %v742_v63 }
 0x34a   :  { %1806 = vmatprep.subr.mxu0 %v1919_v0 }
 0x352   :  { %v1908_v61 = vpop.eup %1907 }
 0x353   :  { %v753_v62 = vmul.f32 %v1908_v61, %v1900_v45  ;;  %v1386_v45 = vld [vmem:[%s2467_s5 + $0x30] sm:$0xff]  ;;  %v1513_v61 = vld [vmem:[%s2468_s4] ss:$0 sm:$0xff] }
 0x355   :  { %1799 = vmatmul.mubr.msk.f32.vlgmr.msra.gmra.mxu0 %vm712_vm2, %v753_v62 }
 0x356   :  { %1808 = vmatprep.mubr.msk.f32.mxu0 %vm1920_vm0, %v1919_v0  ;;  %v1910_v2 = vpop.eup %1909 }
 0x357   :  { %v754_v4 = vmul.f32 %v1910_v2, %v1902_v47  ;;  %v1384_v47 = vld [vmem:[%s2467_s5 + $0x20] sm:$0xff] }
 0x369   :  { %v748_v1 = vpop.xlane.xlu0 %747 }
 0x36a   :  { %1911 = vrcp.f32 %v748_v1  ;;  %v1473_v1 = vlaneseq }
 0x36c   :  { %v1474_v2 = vand.u32 127, %v1473_v1 }
 0x36d   :  { %v834_v3 = vpop.permute.xlu0 %833 }
 0x36e   :  { %1802 = vmatpush3.msra.mxu1 %v834_v3  ;;  %v1514_v3 = vld [vmem:[%s2469_s6] ss:$0 sm:$0xff]  ;;  %vm1475_vm3 = vcmp.lt.s32.totalorder %v1474_v2, 2 }
 0x36f   :  { %1804 = vmatmul.mubr.msk.f32.vlgmr.msra.gmra.mxu1 %vm712_vm2, %v754_v4  ;;  %1811 = vmatprep.subr.mxu1 %v1919_v0 }
 0x370   :  { %1813 = vmatprep.mubr.msk.f32.mxu1 %vm1920_vm0, %v1919_v0 }
 0x377   :  { %v1912_v7 = vpop.eup %1911 }
 0x378   :  { %v756_v9 = vmul.f32 %v1912_v7, %v1904_v55 }
 0x379   :  { %v745_v5 = vpop.xlane.xlu1 %744 }
 0x37a   :  { %1913 = vrcp.f32 %v745_v5 }
 0x37d   :  { %v910_v6 = vpop.permute.xlu1 %909 }
 0x37e   :  { %1807 = vmatpush3.msra.mxu0 %v910_v6 }
 0x37f   :  { %1860 = vmatprep.subr.mxu0 %v1919_v0 }
 0x381   :  { %v986_v8 = vpop.permute.xlu1 %985 }
 0x382   :  { %1812 = vmatpush3.msra.mxu1 %v986_v8 }
 0x383   :  { %1814 = vmatmul.mubr.msk.f32.vlgmr.msra.gmra.mxu1 %vm712_vm2, %v756_v9  ;;  %1816 = vmatprep.subr.mxu1 %v1919_v0 }
 0x384   :  { %1817 = vmatpush3.msra.mxu1 %v1064_v10  ;;  %1824 = vmatprep.mubr.msk.f32.mxu1 %vm1920_vm0, %v1919_v0 }
 0x385   :  { %1818 = vmatprep.subr.mxu1 %v1919_v0 }
 0x386   :  { %1819 = vmatpush3.msra.mxu1 %v1063_v11 }
 0x387   :  { %v1914_v13 = vpop.eup %1913  ;;  %1820 = vmatprep.subr.mxu1 %v1919_v0 }
 0x388   :  { %v755_v14 = vmul.f32 %v1914_v13, %v1906_v57  ;;  %1821 = vmatpush3.msra.mxu1 %v1062_v12 }
 0x389   :  { %1822 = vmatprep.subr.mxu1 %v1919_v0 }
 0x38a   :  { %1809 = vmatmul.mubr.msk.f32.vlgmr.msra.gmra.mxu0 %vm712_vm2, %v755_v14  ;;  %1823 = vmatpush3.msra.mxu1 %v1061_v15 }
 0x38b   :  { %1892 = vmatprep.mubr.msk.f32.mxu0 %vm1920_vm0, %v1919_v0  ;;  %1827 = vmatprep.subr.mxu1 %v1919_v0 }
 0x38c   :  { %1861 = vmatpush3.msra.mxu0 %v1395_v36 }
 0x38d   :  { %1862 = vmatprep.subr.mxu0 %v1919_v0 }
 0x38e   :  { %1863 = vmatpush3.msra.mxu0 %v1394_v37 }
 0x38f   :  { %1864 = vmatprep.subr.mxu0 %v1919_v0 }
 0x390   :  { %1865 = vmatpush3.msra.mxu0 %v1393_v38 }
 0x391   :  { %1866 = vmatprep.subr.mxu0 %v1919_v0 }
 0x392   :  { %1867 = vmatpush3.msra.mxu0 %v1392_v39 }
 0x393   :  { %1868 = vmatprep.subr.mxu0 %v1919_v0 }
 0x394   :  { %1869 = vmatpush3.msra.mxu0 %v1391_v40 }
 0x395   :  { %1870 = vmatprep.subr.mxu0 %v1919_v0 }
 0x396   :  { %1871 = vmatpush3.msra.mxu0 %v1390_v41 }
 0x397   :  { %1872 = vmatprep.subr.mxu0 %v1919_v0 }
 0x398   :  { %1873 = vmatpush3.msra.mxu0 %v1389_v42 }
 0x399   :  { %1874 = vmatprep.subr.mxu0 %v1919_v0 }
 0x39a   :  { %1875 = vmatpush3.msra.mxu0 %v1388_v43 }
 0x39b   :  { %1876 = vmatprep.subr.mxu0 %v1919_v0 }
 0x39c   :  { %1877 = vmatpush3.msra.mxu0 %v1387_v44 }
 0x39d   :  { %1878 = vmatprep.subr.mxu0 %v1919_v0 }
 0x39e   :  { %1879 = vmatpush3.msra.mxu0 %v1386_v45 }
 0x39f   :  { %1880 = vmatprep.subr.mxu0 %v1919_v0 }
 0x3a0   :  { %1881 = vmatpush3.msra.mxu0 %v1385_v46 }
 0x3a1   :  { %1882 = vmatprep.subr.mxu0 %v1919_v0 }
 0x3a2   :  { %1883 = vmatpush3.msra.mxu0 %v1384_v47 }
 0x3a3   :  { %1884 = vmatprep.subr.mxu0 %v1919_v0 }
 0x3a4   :  { %1885 = vmatpush3.msra.mxu0 %v1383_v48 }
 0x3a5   :  { %1886 = vmatprep.subr.mxu0 %v1919_v0 }
 0x3a6   :  { %1887 = vmatpush3.msra.mxu0 %v1382_v49 }
 0x3a7   :  { %1888 = vmatprep.subr.mxu0 %v1919_v0 }
 0x3a8   :  { %1889 = vmatpush3.msra.mxu0 %v1381_v50 }
 0x3a9   :  { %1890 = vmatprep.subr.mxu0 %v1919_v0 }
 0x3aa   :  { %1891 = vmatpush3.msra.mxu0 %v1380_v51 }
 0x415   :  { %v829_v17 = vpop.f32.mrf.mxu0 }
 0x416   :  { %1825 = vmatmul.mubr.msk.f32.vlgmr.msra.gmra.mxu1 %vm402_vm1, %v829_v17 }
 0x417   :  { %v1800_v19 = vpop.f32.mrf.mxu0  ;;  %1828 = vmatpush3.msra.mxu1 %v1068_v16  ;;  %1835 = vmatprep.mubr.msk.f32.mxu1 %vm1920_vm0, %v1919_v0 }
 0x418   :  { %1829 = vmatprep.subr.mxu1 %v1919_v0 }
 0x419   :  { %1830 = vmatpush3.msra.mxu1 %v1067_v18 }
 0x41a   :  { %1831 = vmatprep.subr.mxu1 %v1919_v0 }
 0x41b   :  { %1832 = vmatpush3.msra.mxu1 %v1066_v20 }
 0x41c   :  { %1833 = vmatprep.subr.mxu1 %v1919_v0 }
 0x41d   :  { %1834 = vmatpush3.msra.mxu1 %v1065_v21 }
 0x41e   :  { %1838 = vmatprep.subr.mxu1 %v1919_v0 }
 0x42f   :  { %v905_v23 = vpop.f32.mrf.mxu1 }
 0x430   :  { %1836 = vmatmul.mubr.msk.f32.vlgmr.msra.gmra.mxu1 %vm402_vm1, %v905_v23 }
 0x431   :  { %v1805_v25 = vpop.f32.mrf.mxu1  ;;  %1839 = vmatpush3.msra.mxu1 %v1072_v22  ;;  %1846 = vmatprep.mubr.msk.f32.mxu1 %vm1920_vm0, %v1919_v0 }
 0x432   :  { %1840 = vmatprep.subr.mxu1 %v1919_v0 }
 0x433   :  { %1841 = vmatpush3.msra.mxu1 %v1071_v24 }
 0x434   :  { %1842 = vmatprep.subr.mxu1 %v1919_v0 }
 0x435   :  { %1843 = vmatpush3.msra.mxu1 %v1070_v26 }
 0x436   :  { %1844 = vmatprep.subr.mxu1 %v1919_v0 }
 0x437   :  { %1845 = vmatpush3.msra.mxu1 %v1069_v27 }
 0x438   :  { %1849 = vmatprep.subr.mxu1 %v1919_v0 }
 0x443   :  { %v1057_v28 = vpop.f32.mrf.mxu1 }
 0x445   :  { %v1815_v29 = vpop.f32.mrf.mxu1 }
 0x44a   :  { %v981_v31 = vpop.f32.mrf.mxu0 }
 0x44b   :  { %1847 = vmatmul.mubr.msk.f32.vlgmr.msra.gmra.mxu1 %vm402_vm1, %v981_v31 }
 0x44c   :  { %1850 = vmatpush3.msra.mxu1 %v1076_v30  ;;  %v1810_v33 = vpop.f32.mrf.mxu0  ;;  %1857 = vmatprep.mubr.msk.f32.mxu1 %vm1920_vm0, %v1919_v0 }
 0x44d   :  { %1851 = vmatprep.subr.mxu1 %v1919_v0 }
 0x44e   :  { %1852 = vmatpush3.msra.mxu1 %v1075_v32 }
 0x44f   :  { %1853 = vmatprep.subr.mxu1 %v1919_v0 }
 0x450   :  { %1854 = vmatpush3.msra.mxu1 %v1074_v34 }
 0x451   :  { %1855 = vmatprep.subr.mxu1 %v1919_v0 }
 0x452   :  { %1856 = vmatpush3.msra.mxu1 %v1073_v35 }
 0x453   :  { %1858 = vmatmul.mubr.msk.f32.vlgmr.msra.gmra.mxu1 %vm402_vm1, %v1057_v28 }
 0x4d6   :  { %v1146_v52 = vpop.f32.mrf.mxu1 }
 0x4d8   :  { %v1826_v53 = vpop.f32.mrf.mxu1 }
 0x4f0   :  { %v1219_v54 = vpop.f32.mrf.mxu1 }
 0x4f1   :  { %v1369_v58 = vadd.f32 %v1219_v54, %v1146_v52 }
 0x4f2   :  { %v1837_v55 = vpop.f32.mrf.mxu1 }
 0x50b   :  { %v1292_v56 = vpop.f32.mrf.mxu1 }
 0x50c   :  { %v1370_v59 = vadd.f32 %v1369_v58, %v1292_v56 }
 0x50d   :  { %v1848_v57 = vpop.f32.mrf.mxu1 }
 0x513   :  { %v1365_v60 = vpop.f32.mrf.mxu1 }
 0x514   :  { %v1371_v62 = vadd.f32 %v1370_v59, %v1365_v60 }
 0x515   :  { %v1859_v0 = vpop.f32.mrf.mxu1 }
 0x516   :  { %v1379_v63 = vadd.f32 %v1513_v61, %v1371_v62 }
 0x518   :  { %1893 = vmatmul.mubr.f32.vlgmr.msra.gmra.mxu0 %v1379_v63 }
 0x5d8   :  { %v1469_v4 = vpop.f32.mrf.mxu0 }
 0x5d9   :  { %v1470_v5 = vadd.f32 %v1514_v3, %v1469_v4 }
 0x5da   :  { %v1894_v6 = vpop.f32.mrf.mxu0 }
 0x5db   :  { %v1476_v7 = vsel %vm1475_vm3, %v1470_v5, -1e+30 }
 0x5dc   :  { %1477 = vmax.xlane.f32.xlu0 %v1476_v7 }
 0x665   :  { %v1478_v8 = vpop.xlane.xlu0 %1477 }
 0x666   :  { %v1479_v9 = vsub.f32 %v1476_v7, %v1478_v8 }
 0x668   :  { %v1480_v10 = vmul.f32 1.442695, %v1479_v9 }
 0x66a   :  { %1915 = vpow2.f32 %v1480_v10 }
 0x677   :  { %v1916_v11 = vpop.eup %1915 }
 0x678   :  { %1482 = vadd.xlane.f32.xlu1 %v1916_v11 }
 0x701   :  { %v1483_v12 = vpop.xlane.xlu1 %1482 }
 0x702   :  { %1917 = vlog2.f32 %v1483_v12 }
 0x70f   :  { %v1918_v13 = vpop.eup %1917 }
 0x710   :  { %v1485_v14 = vmul.f32 0.6931472, %v1918_v13 }
 0x712   :  { %v1486_v15 = vadd.f32 %v1485_v14, %v1478_v8 }
 0x714   :  { %v1487_v16 = vsub.f32 %v1476_v7, %v1486_v15 }
 0x716   :  { %1488 = vst [vmem:[%s2470_s7] sm:$0xff] %v1487_v16 }

</bundles_post_ra>
